<compile_context>
chip_gen: v5e
topology: v5e:2x2
jax: 0.10.0
libtpu: 0.0.40
codegen_flags: <defaults>
</compile_context>

<pallas_src>
import functools
import math

import jax
import jax.numpy as jnp
from jax import lax
from jax.experimental import pallas as pl
from jax.experimental.pallas import tpu as pltpu


def _derive_vmem_limit():
    """~75% of physical VMEM, capped at 100 MiB (v7x-safe fallback: 48 MiB)."""
    try:
        cap = pltpu.get_tpu_info().vmem_capacity_bytes
        return int(min(int(cap * 0.75), 100 * 1024 * 1024))
    except Exception:
        return 48 * 1024 * 1024


_VMEM_LIMIT = _derive_vmem_limit()

# BERT uses exact (erf) GELU; flip to True to route the epilogue through the EUP
# tanh approximation if exactness is not required (numerics change slightly).
_GELU_APPROX = False


def _pick_tile(dim, target, align):
    """Largest tile <= target that divides `dim` and is a multiple of `align`,
    falling back to the full dim (full-extent blocks are always legal)."""
    if dim <= target:
        return dim
    t = (target // align) * align
    while t >= align:
        if dim % t == 0:
            return t
        t -= align
    return dim


def _as_bf16(x):
    return x if x.dtype == jnp.bfloat16 else x.astype(jnp.bfloat16)


# ----------------------------- Pallas kernels ------------------------------ #

def _matmul_kernel(x_ref, w_ref, b_ref, o_ref, acc_ref, *, act):
    """Tiled matmul with f32 accumulator, optional GELU epilogue."""
    @pl.when(pl.program_id(2) == 0)
    def _():
        acc_ref[...] = jnp.zeros_like(acc_ref)

    acc_ref[...] += jnp.dot(x_ref[...], w_ref[...],
                            preferred_element_type=jnp.float32)

    @pl.when(pl.program_id(2) == pl.num_programs(2) - 1)
    def _():
        y = acc_ref[...] + b_ref[...]
        if act == "gelu":
            y = jax.nn.gelu(y, approximate=_GELU_APPROX)
        o_ref[...] = y.astype(o_ref.dtype)


def pallas_linear(x, w, b, act=None, out_dtype=jnp.float32,
                  tm=512, tn=512, tk=1024):
    # x: (M, K), w: (K, N), b: (N,) -> (M, N)
    M, K = x.shape
    N = w.shape[1]
    tm = _pick_tile(M, tm, 16)    # 16-row alignment: bf16 packs two rows / sublane
    tn = _pick_tile(N, tn, 128)
    tk = _pick_tile(K, tk, 128)
    grid = (M // tm, N // tn, K // tk)
    return pl.pallas_call(
        functools.partial(_matmul_kernel, act=act),
        out_shape=jax.ShapeDtypeStruct((M, N), out_dtype),
        grid=grid,
        in_specs=[pl.BlockSpec((tm, tk), lambda i, j, k: (i, k)),
                  pl.BlockSpec((tk, tn), lambda i, j, k: (k, j)),
                  pl.BlockSpec((1, tn), lambda i, j, k: (0, j))],
        out_specs=pl.BlockSpec((tm, tn), lambda i, j, k: (i, j)),
        scratch_shapes=[pltpu.VMEM((tm, tn), jnp.float32)],
        compiler_params=pltpu.CompilerParams(
            dimension_semantics=("parallel", "parallel", "arbitrary"),
            vmem_limit_bytes=_VMEM_LIMIT),
    )(_as_bf16(x), _as_bf16(w), b.reshape(1, N).astype(jnp.float32))


def _matmul_add_ln_kernel(x_ref, w_ref, b_ref, r_ref, g_ref, bt_ref,
                          o32_ref, o16_ref, acc_ref, *, eps):
    """Tiled matmul whose epilogue fuses bias + residual-add + LayerNorm and
    emits both an f32 residual-stream output and a bf16 activation output."""
    @pl.when(pl.program_id(1) == 0)
    def _():
        acc_ref[...] = jnp.zeros_like(acc_ref)

    acc_ref[...] += jnp.dot(x_ref[...], w_ref[...],
                            preferred_element_type=jnp.float32)

    @pl.when(pl.program_id(1) == pl.num_programs(1) - 1)
    def _():
        h = acc_ref[...] + b_ref[...] + r_ref[...]
        mu = jnp.mean(h, axis=-1, keepdims=True)
        var = jnp.mean(jnp.square(h - mu), axis=-1, keepdims=True)
        y = (h - mu) * lax.rsqrt(var + eps) * g_ref[...] + bt_ref[...]
        o32_ref[...] = y
        o16_ref[...] = y.astype(jnp.bfloat16)


def pallas_linear_add_layernorm(x, w, b, res, gamma, beta,
                                eps=1e-12, tm=512, tk=1024):
    # LayerNorm(x @ w + b + res); N (= hidden) is kept un-tiled because LN reduces
    # over it; K is the "arbitrary" accumulation axis, M is megacore-parallel.
    # Returns (f32 residual stream, bf16 activation) with no wrapper-side casts.
    M, K = x.shape
    N = w.shape[1]
    tm = _pick_tile(M, tm, 16)
    tk = _pick_tile(K, tk, 128)
    grid = (M // tm, K // tk)
    out32, out16 = pl.pallas_call(
        functools.partial(_matmul_add_ln_kernel, eps=eps),
        out_shape=(jax.ShapeDtypeStruct((M, N), jnp.float32),
                   jax.ShapeDtypeStruct((M, N), jnp.bfloat16)),
        grid=grid,
        in_specs=[pl.BlockSpec((tm, tk), lambda i, k: (i, k)),
                  pl.BlockSpec((tk, N), lambda i, k: (k, 0)),
                  pl.BlockSpec((1, N), lambda i, k: (0, 0)),
                  pl.BlockSpec((tm, N), lambda i, k: (i, 0)),
                  pl.BlockSpec((1, N), lambda i, k: (0, 0)),
                  pl.BlockSpec((1, N), lambda i, k: (0, 0))],
        out_specs=[pl.BlockSpec((tm, N), lambda i, k: (i, 0)),
                   pl.BlockSpec((tm, N), lambda i, k: (i, 0))],
        scratch_shapes=[pltpu.VMEM((tm, N), jnp.float32)],
        compiler_params=pltpu.CompilerParams(
            dimension_semantics=("parallel", "arbitrary"),
            vmem_limit_bytes=_VMEM_LIMIT),
    )(_as_bf16(x), _as_bf16(w), b.reshape(1, N).astype(jnp.float32),
      res.astype(jnp.float32),
      gamma.reshape(1, N).astype(jnp.float32),
      beta.reshape(1, N).astype(jnp.float32))
    return out32, out16


def _ln_kernel(x_ref, g_ref, b_ref, o32_ref, o16_ref, *, eps):
    h = x_ref[...].astype(jnp.float32)
    mu = jnp.mean(h, axis=-1, keepdims=True)
    var = jnp.mean(jnp.square(h - mu), axis=-1, keepdims=True)
    y = (h - mu) * lax.rsqrt(var + eps) * g_ref[...] + b_ref[...]
    o32_ref[...] = y
    o16_ref[...] = y.astype(jnp.bfloat16)


def pallas_layernorm(x, gamma, beta, eps=1e-12, tm=512):
    # Plain LayerNorm (no residual input => no wasted zeros DMA). Emits f32 + bf16.
    M, H = x.shape
    tm = _pick_tile(M, tm, 16)
    return pl.pallas_call(
        functools.partial(_ln_kernel, eps=eps),
        out_shape=(jax.ShapeDtypeStruct((M, H), jnp.float32),
                   jax.ShapeDtypeStruct((M, H), jnp.bfloat16)),
        grid=(M // tm,),
        in_specs=[pl.BlockSpec((tm, H), lambda i: (i, 0)),
                  pl.BlockSpec((1, H), lambda i: (0, 0)),
                  pl.BlockSpec((1, H), lambda i: (0, 0))],
        out_specs=[pl.BlockSpec((tm, H), lambda i: (i, 0)),
                   pl.BlockSpec((tm, H), lambda i: (i, 0))],
        compiler_params=pltpu.CompilerParams(
            dimension_semantics=("parallel",),
            vmem_limit_bytes=_VMEM_LIMIT),
    )(x, gamma.reshape(1, H), beta.reshape(1, H))


def _attn_kernel(q_ref, k_ref, v_ref, o_ref, *, head_dim, heads_per_block):
    # per (batch, head-pack): refs are (S, heads_per_block*Dh) bf16 tiles sliced out
    # of the fused QKV. The 1/sqrt(Dh) scale is already folded into the Q weights.
    for i in range(heads_per_block):       # static unroll over packed heads
        q = q_ref[:, pl.ds(i * head_dim, head_dim)]
        k = k_ref[:, pl.ds(i * head_dim, head_dim)]
        v = v_ref[:, pl.ds(i * head_dim, head_dim)]
        # scores without transposing K: contract the head dims of Q and K on the MXU
        s = lax.dot_general(q, k, (((1,), (1,)), ((), ())),
                            preferred_element_type=jnp.float32)
        m = jnp.max(s, axis=-1, keepdims=True)
        p = jnp.exp(s - m)
        l = jnp.sum(p, axis=-1, keepdims=True)
        # normalize AFTER the PV matmul: S*Dh multiplies instead of S*S
        ctx = jnp.dot(p.astype(v.dtype), v, preferred_element_type=jnp.float32)
        ctx = ctx * pl.reciprocal(l, approx=True)           # EUP reciprocal
        o_ref[:, pl.ds(i * head_dim, head_dim)] = ctx.astype(o_ref.dtype)


def pallas_attention(qkv, num_heads, head_dim, out_dtype=jnp.bfloat16):
    # qkv: (B, S, 3H) with layout [Q heads | K heads | V heads] along the last dim.
    # Head slicing / merging is done entirely by BlockSpec index maps. When Dh < 128
    # multiple heads are packed per grid step so the block's lane dim is >= 128
    # (lane-dense loads / unmasked vst stores, fewer grid-step overheads).
    B, S, threeH = qkv.shape
    NH, Dh = num_heads, head_dim
    H = NH * Dh
    hp = max(1, 128 // Dh)
    while NH % hp != 0:
        hp -= 1
    NHb = NH // hp                      # number of head-pack blocks
    return pl.pallas_call(
        functools.partial(_attn_kernel, head_dim=Dh, heads_per_block=hp),
        out_shape=jax.ShapeDtypeStruct((B, S, H), out_dtype),
        grid=(B, NHb),
        in_specs=[pl.BlockSpec((None, S, hp * Dh), lambda b, h: (b, 0, h)),
                  pl.BlockSpec((None, S, hp * Dh), lambda b, h: (b, 0, NHb + h)),
                  pl.BlockSpec((None, S, hp * Dh), lambda b, h: (b, 0, 2 * NHb + h))],
        out_specs=pl.BlockSpec((None, S, hp * Dh), lambda b, h: (b, 0, h)),
        compiler_params=pltpu.CompilerParams(
            dimension_semantics=("parallel", "parallel"),
            vmem_limit_bytes=_VMEM_LIMIT),
    )(qkv, qkv, qkv)


def _conv1d_kernel(x_ref, w_ref, o_ref, *, pad):
    # x: (S, C_in) bf16; w: (K, C_in, tco) bf16. "Same" padding, no bias.
    # Shifted taps via pltpu.roll (XLU slot) + row mask instead of concatenate copies.
    x = x_ref[...]
    S = x.shape[0]
    K = w_ref.shape[0]
    row = lax.broadcasted_iota(jnp.int32, (S, 1), 0)
    acc = jnp.zeros(o_ref.shape, jnp.float32)
    for k in range(K):                       # static unroll over the small kernel width
        d = k - pad                          # tap reads x[i + d]
        xs = x if d % S == 0 else pltpu.roll(x, shift=(-d) % S, axis=0)
        valid = (row + d >= 0) & (row + d < S)
        xs = jnp.where(valid, xs, jnp.zeros_like(xs))
        acc = acc + jnp.dot(xs, w_ref[k], preferred_element_type=jnp.float32)
    o_ref[...] = acc.astype(o_ref.dtype)


def pallas_conv1d_same(x, w, out_dtype=jnp.float32, tco=512):
    # x: (B, S, C_in), w: (K, C_in, C_out) -> (B, S, C_out). Equivalent to
    # nn.Conv1d(C, C, K, bias=False, padding=(K-1)//2) applied on x.transpose(1,2)
    # and transposed back (the NCL<->NLC transposes are folded into the layout).
    # Output channels are tiled as a second parallel grid axis so megacore / v7x's
    # two TensorCores can shard the conv even at small batch.
    # TODO(synk): tile the sequence axis too for very long S (keeps the accumulator
    # and the (S, C) operand bounded under v7x's 64 MiB VMEM).
    B, S, C = x.shape
    K, _, Co = w.shape
    pad = (K - 1) // 2
    tco = _pick_tile(Co, tco, 128)
    return pl.pallas_call(
        functools.partial(_conv1d_kernel, pad=pad),
        out_shape=jax.ShapeDtypeStruct((B, S, Co), out_dtype),
        grid=(B, Co // tco),
        in_specs=[pl.BlockSpec((None, S, C), lambda b, j: (b, 0, 0)),
                  pl.BlockSpec((K, C, tco), lambda b, j: (0, 0, j))],
        out_specs=pl.BlockSpec((None, S, tco), lambda b, j: (b, 0, j)),
        compiler_params=pltpu.CompilerParams(
            dimension_semantics=("parallel", "parallel"),
            vmem_limit_bytes=_VMEM_LIMIT),
    )(_as_bf16(x), _as_bf16(w))


# ------------------------------ model glue --------------------------------- #

def init_params(key, cfg):
    H, I, K = cfg["hidden_size"], cfg["intermediate"], cfg["kernel_size"]
    Dh = H // cfg["num_heads"]
    attn_scale = 1.0 / math.sqrt(Dh)

    def nrm(k, shape, scale=0.02, dtype=jnp.bfloat16):
        return (scale * jax.random.normal(k, shape, dtype=jnp.float32)).astype(dtype)

    keys = jax.random.split(key, 4 + cfg["num_layers"])
    params = {
        "word_emb": nrm(keys[0], (cfg["vocab_size"], H), dtype=jnp.float32),
        "pos_emb": nrm(keys[1], (cfg["max_pos"], H), dtype=jnp.float32),
        "type_emb": nrm(keys[2], (2, H), dtype=jnp.float32),
        "emb_ln_g": jnp.ones((H,), jnp.float32),
        "emb_ln_b": jnp.zeros((H,), jnp.float32),
        # Conv1d(hidden, hidden, kernel_size, bias=False) weight stored (K, C_in, C_out)
        "conv_w": nrm(keys[3], (K, H, H)),
        "layers": [],
    }
    for li in range(cfg["num_layers"]):
        lk = jax.random.split(keys[4 + li], 6)
        # 1/sqrt(Dh) folded into the Q projection (weights AND bias) once, at prep
        # time, so the attention kernel never does a per-step VPU scale.
        wq = (nrm(lk[0], (H, H)).astype(jnp.float32) * attn_scale).astype(jnp.bfloat16)
        wk, wv = nrm(lk[1], (H, H)), nrm(lk[2], (H, H))
        bq = jnp.zeros((H,), jnp.float32) * attn_scale
        params["layers"].append({
            # fused QKV projection weight: one (H, 3H) matmul instead of three (H, H)
            "w_qkv": jnp.concatenate([wq, wk, wv], axis=1),
            "b_qkv": jnp.concatenate([bq, jnp.zeros((2 * H,), jnp.float32)]),
            "wo": nrm(lk[3], (H, H)), "bo": jnp.zeros((H,), jnp.float32),
            "ln1_g": jnp.ones((H,), jnp.float32), "ln1_b": jnp.zeros((H,), jnp.float32),
            "w1": nrm(lk[4], (H, I)), "b1": jnp.zeros((I,), jnp.float32),
            "w2": nrm(lk[5], (I, H)), "b2": jnp.zeros((H,), jnp.float32),
            "ln2_g": jnp.ones((H,), jnp.float32), "ln2_b": jnp.zeros((H,), jnp.float32),
        })
    return params


def bert_cnn_forward(params, token_ids, cfg):
    """BertCNN.forward: x = bert(x)[0]; x = cnn(x)  -> (B, S, H)."""
    B, S = token_ids.shape
    H = cfg["hidden_size"]
    NH = cfg["num_heads"]
    Dh = H // NH

    # --- BERT embeddings (gather stays in glue) + LayerNorm (Pallas) ---
    emb = (params["word_emb"][token_ids]
           + params["pos_emb"][:S][None, :, :]
           + params["type_emb"][0][None, None, :])
    x = emb.reshape(B * S, H).astype(jnp.float32)
    # x_f32 is the residual stream; x_bf16 feeds the next matmul's M-side directly.
    x_f32, x_bf16 = pallas_layernorm(x, params["emb_ln_g"], params["emb_ln_b"])

    # --- BERT encoder layers (matmuls / softmax / LN all in Pallas) ---
    for layer in params["layers"]:
        # fused QKV projection: bf16 MXU inputs, f32 accumulation, bf16 output
        qkv = pallas_linear(x_bf16, layer["w_qkv"], layer["b_qkv"],
                            out_dtype=jnp.bfloat16)
        # per-(batch, head-pack) attention; head split/merge via BlockSpec index maps
        ctx = pallas_attention(qkv.reshape(B, S, 3 * H), NH, Dh)
        ctx = ctx.reshape(B * S, H)

        # output projection fused with residual-add + LayerNorm epilogue
        x_f32, x_bf16 = pallas_linear_add_layernorm(
            ctx, layer["wo"], layer["bo"], x_f32, layer["ln1_g"], layer["ln1_b"])

        # FFN: GELU fused in w1 epilogue; w2 fused with residual-add + LayerNorm
        ff = pallas_linear(x_bf16, layer["w1"], layer["b1"], act="gelu",
                           out_dtype=jnp.bfloat16)
        x_f32, x_bf16 = pallas_linear_add_layernorm(
            ff, layer["w2"], layer["b2"], x_f32, layer["ln2_g"], layer["ln2_b"])

    hidden = x_bf16.reshape(B, S, H)     # bert(x)[0]  (last_hidden_state), bf16 feed

    # --- CNN: x.transpose(1,2) -> Conv1d(same pad, no bias) -> transpose back ---
    return pallas_conv1d_same(hidden, params["conv_w"])


# --------------------------------- main ------------------------------------ #

if __name__ == "__main__":
    # Small demo config (hidden / Dh / intermediate chosen as 128-multiples so every
    # kernel's lane dim is dense; real BERT sizes use the same code paths, with
    # Dh=64 heads packed two-per-block in the attention kernel).
    cfg = dict(vocab_size=100, max_pos=16, hidden_size=256, num_heads=2,
               intermediate=512, num_layers=2, kernel_size=3, batch=2, seq=8)

    key = jax.random.PRNGKey(0)
    pkey, dkey = jax.random.split(key)
    params = init_params(pkey, cfg)

    token_ids = jax.random.randint(dkey, (cfg["batch"], cfg["seq"]),
                                   0, cfg["vocab_size"], dtype=jnp.int32)

    out = bert_cnn_forward(params, token_ids, cfg)
    out = jax.block_until_ready(out)

    assert out.shape == (cfg["batch"], cfg["seq"], cfg["hidden_size"]), out.shape
    assert bool(jnp.all(jnp.isfinite(out)))
    print("KERNEL_OK")
</pallas_src>

<mosaic_0001>
module attributes {stable_mosaic.version = 11 : i64} {
  func.func @_ln_kernel(%arg0: i32, %arg1: memref<16x256xf32, #tpu.memory_space<vmem>>, %arg2: memref<1x256xf32, #tpu.memory_space<vmem>>, %arg3: memref<1x256xf32, #tpu.memory_space<vmem>>, %arg4: memref<16x256xf32, #tpu.memory_space<vmem>>, %arg5: memref<16x256xbf16, #tpu.memory_space<vmem>>) attributes {dimension_semantics = [#tpu.dimension_semantics<parallel>], iteration_bounds = array<i64: 1>, scalar_prefetch = 0 : i64, scratch_operands = 0 : i64, tpu.core_type = #tpu.core_type<tc>, window_params = [{transform_indices = @transform_0, window_bounds = array<i64: 16, 256>}, {pipeline_mode = #tpu.pipeline_mode<synchronous>, transform_indices = @transform_1, window_bounds = array<i64: 1, 256>}, {pipeline_mode = #tpu.pipeline_mode<synchronous>, transform_indices = @transform_2, window_bounds = array<i64: 1, 256>}, {transform_indices = @transform_3, window_bounds = array<i64: 16, 256>}, {transform_indices = @transform_4, window_bounds = array<i64: 16, 256>}]} {
    %c0 = arith.constant 0 : index
    %c0_0 = arith.constant 0 : index
    %0 = vector.load %arg1[%c0, %c0_0] : memref<16x256xf32, #tpu.memory_space<vmem>>, vector<16x256xf32>
    %cst = arith.constant dense<0.000000e+00> : vector<16xf32>
    %1 = vector.multi_reduction <add>, %0, %cst [1] : vector<16x256xf32> to vector<16xf32>
    %2 = vector.shape_cast %1 : vector<16xf32> to vector<16x1xf32>
    %cst_1 = arith.constant 2.560000e+02 : f32
    %3 = vector.broadcast %cst_1 : f32 to vector<16x1xf32>
    %4 = arith.divf %2, %3 : vector<16x1xf32>
    %5 = vector.broadcast %4 : vector<16x1xf32> to vector<16x256xf32>
    %6 = arith.subf %0, %5 : vector<16x256xf32>
    %7 = arith.mulf %6, %6 : vector<16x256xf32>
    %cst_2 = arith.constant dense<0.000000e+00> : vector<16xf32>
    %8 = vector.multi_reduction <add>, %7, %cst_2 [1] : vector<16x256xf32> to vector<16xf32>
    %9 = vector.shape_cast %8 : vector<16xf32> to vector<16x1xf32>
    %cst_3 = arith.constant 2.560000e+02 : f32
    %10 = vector.broadcast %cst_3 : f32 to vector<16x1xf32>
    %11 = arith.divf %9, %10 : vector<16x1xf32>
    %12 = vector.broadcast %4 : vector<16x1xf32> to vector<16x256xf32>
    %13 = arith.subf %0, %12 : vector<16x256xf32>
    %cst_4 = arith.constant 9.99999996E-13 : f32
    %14 = vector.broadcast %cst_4 : f32 to vector<16x1xf32>
    %15 = arith.addf %11, %14 : vector<16x1xf32>
    %16 = math.rsqrt %15 : vector<16x1xf32>
    %17 = vector.broadcast %16 : vector<16x1xf32> to vector<16x256xf32>
    %18 = arith.mulf %13, %17 : vector<16x256xf32>
    %c0_5 = arith.constant 0 : index
    %c0_6 = arith.constant 0 : index
    %19 = vector.load %arg2[%c0_5, %c0_6] : memref<1x256xf32, #tpu.memory_space<vmem>>, vector<1x256xf32>
    %20 = vector.broadcast %19 : vector<1x256xf32> to vector<16x256xf32>
    %21 = arith.mulf %18, %20 : vector<16x256xf32>
    %c0_7 = arith.constant 0 : index
    %c0_8 = arith.constant 0 : index
    %22 = vector.load %arg3[%c0_7, %c0_8] : memref<1x256xf32, #tpu.memory_space<vmem>>, vector<1x256xf32>
    %23 = vector.broadcast %22 : vector<1x256xf32> to vector<16x256xf32>
    %24 = arith.addf %21, %23 : vector<16x256xf32>
    %c0_9 = arith.constant 0 : index
    %c0_10 = arith.constant 0 : index
    %25 = vector.load %arg4[%c0_9, %c0_10] : memref<16x256xf32, #tpu.memory_space<vmem>>, vector<16x256xf32>
    tpu.vector_store %arg4[%c0_9, %c0_10], %24 {strides = array<i32>} : memref<16x256xf32, #tpu.memory_space<vmem>>, vector<16x256xf32>,
    %26 = arith.truncf %24 : vector<16x256xf32> to vector<16x256xbf16>
    %c0_11 = arith.constant 0 : index
    %c0_12 = arith.constant 0 : index
    %27 = vector.load %arg5[%c0_11, %c0_12] : memref<16x256xbf16, #tpu.memory_space<vmem>>, vector<16x256xbf16>
    tpu.vector_store %arg5[%c0_11, %c0_12], %26 {strides = array<i32>} : memref<16x256xbf16, #tpu.memory_space<vmem>>, vector<16x256xbf16>,
    return
  }
  func.func @transform_0(%arg0: i32) -> (i32, i32) {
    %c0_i32 = arith.constant 0 : i32
    %c0_i32_0 = arith.constant 0 : i32
    return %arg0, %c0_i32 : i32, i32
  }
  func.func @transform_1(%arg0: i32) -> (i32, i32) {
    %c0_i32 = arith.constant 0 : i32
    %c0_i32_0 = arith.constant 0 : i32
    %c0_i32_1 = arith.constant 0 : i32
    return %c0_i32, %c0_i32_0 : i32, i32
  }
  func.func @transform_2(%arg0: i32) -> (i32, i32) {
    %c0_i32 = arith.constant 0 : i32
    %c0_i32_0 = arith.constant 0 : i32
    %c0_i32_1 = arith.constant 0 : i32
    return %c0_i32, %c0_i32_0 : i32, i32
  }
  func.func @transform_3(%arg0: i32) -> (i32, i32) {
    %c0_i32 = arith.constant 0 : i32
    %c0_i32_0 = arith.constant 0 : i32
    return %arg0, %c0_i32 : i32, i32
  }
  func.func @transform_4(%arg0: i32) -> (i32, i32) {
    %c0_i32 = arith.constant 0 : i32
    %c0_i32_0 = arith.constant 0 : i32
    return %arg0, %c0_i32 : i32, i32
  }
}

</mosaic_0001>

<bundles_post_ra>
// kernel: tpu_custom_call.1
= control target key start
LH: loop header
LB: loop body
LE: loop exit
PB: predicated region body
PF: predicated region fallthrough
CT: control target
= control target key end

     0   :  { %10 = vsyncpa [#allocation3], 0  ;;  %s388_s0 = inlined_call_operand.hbm [shape: f32[16,256], index: 0, kind: input, shape index: {}]   ;;  %s389_s1 = inlined_call_operand.hbm [shape: f32[1,256], index: 1, kind: input, shape index: {}]   ;;  %s390_s2 = inlined_call_operand.hbm [shape: f32[1,256], index: 2, kind: input, shape index: {}]   ;;  %s391_s3 = inlined_call_operand.hbm [shape: f32[16,256], index: 3, kind: output, shape index: {0}]   ;;  %s392_s4 = inlined_call_operand.hbm [shape: bf16[16,256], index: 4, kind: output, shape index: {1}]  }
   0x1   :  { %11 = vsyncpa [#allocation6], 0 }
   0x2   :  { %12 = vsyncpa [#allocation4], 0  ;;  %s32_s17 = sshll.u32 %s389_s1, 4  ;;  %s33_s17 = int_to_ptr.hbm [resolvable:$true] %s32_s17 }
   0x3   :  { %13 = vsyncpa [#allocation10], 0  ;;  %s332_s18 = smov [#allocation5]   ;;  %s18_s22 = sshll.u32 %s388_s0, 4  ;;  %s19_s22 = int_to_ptr.hbm [resolvable:$true] %s18_s22 }
   0x4   :  { %s34_s19 = sshll.u32 %s332_s18, 4  ;;  %s333_s23 = smov [#allocation2]   ;;  %s35_s19 = int_to_ptr.vmem [resolvable:$true] %s34_s19 }
   0x5   :  { %37 = dma.hbm_to_vmem [thread:$0]  %s33_s17, 32, %s35_s19, [#allocation6]  }
   0x6   :  { %s20_s24 = sshll.u32 %s333_s23, 4  ;;  %s334_s25 = smov 256   ;;  %s21_s24 = int_to_ptr.vmem [resolvable:$true] %s20_s24 }
   0x7   :  { %s335_s26 = smov 16   ;;  %s43_s28 = sshll.u32 %s390_s2, 4  ;;  %s44_s28 = int_to_ptr.hbm [resolvable:$true] %s43_s28 }
   0x8   :  { %26 = dma.hbm_to_vmem [thread:$0]  %s19_s22, 512, %s21_s24, [#allocation3], %s334_s25, %s334_s25, %s335_s26  }
   0x9   :  { %s336_s29 = smov [#allocation7]  }
   0xa   :  { %s45_s30 = sshll.u32 %s336_s29, 4  ;;  %s46_s30 = int_to_ptr.vmem [resolvable:$true] %s45_s30 }
   0xb   :  { %48 = dma.hbm_to_vmem [thread:$0]  %s44_s28, 32, %s46_s30, [#allocation6]  }
   0xc   :  { %324 = dma.done.wait [#allocation3], 512  }
   0xd   :  { %325 = vsyncadd [#allocation3], 4294966784 }
   0xe   :  { %326 = dma.done.wait [#allocation6], 64  }
   0xf   :  { %327 = vsyncadd [#allocation6], 4294967232  ;;  %v61_v0 = vld [vmem:[#allocation2] sm:$0xff]  ;;  %v62_v1 = vld [vmem:[#allocation2 + $0x8] sm:$0xff]  ;;  %v337_v6 = vmov 256.0   ;;  %s338_s0 = smov [#allocation8]  }
  0x10   :  { %v65_v2 = vadd.f32 %v62_v1, %v61_v0  ;;  %v63_v3 = vld [vmem:[#allocation2 + $0x10] sm:$0xff]  ;;  %v64_v4 = vld [vmem:[#allocation2 + $0x18] sm:$0xff]  ;;  %198 = vrcp.f32 %v337_v6  ;;  %v122_v37 = vld [vmem:[#allocation5] sm:$0x3]  ;;  %s154_s2 = sshll.u32 %s338_s0, 4  ;;  %s156_s7 = sshll.u32 %s391_s3, 4  ;;  %s155_s2 = int_to_ptr.vmem [resolvable:$true] %s154_s2  ;;  %s157_s7 = int_to_ptr.hbm [resolvable:$true] %s156_s7 }
  0x11   :  { %v68_v5 = vadd.f32 %v64_v4, %v63_v3  ;;  %v132_v42 = vld [vmem:[#allocation7] sm:$0x3]  ;;  %v124_v43 = vperm.slane %v122_v37, 0  ;;  %v125_v44 = vperm.slane %v122_v37, 1  ;;  %s339_s8 = smov [#allocation9]   ;;  %s169_s12 = sshll.u32 %s392_s4, 4  ;;  %s170_s12 = int_to_ptr.hbm [resolvable:$true] %s169_s12 }
  0x12   :  { %66 = vadd.xlane.f32.xlu0 %v65_v2  ;;  %v134_v49 = vperm.slane %v132_v42, 0  ;;  %v135_v50 = vperm.slane %v132_v42, 1  ;;  %s167_s9 = sshll.u32 %s339_s8, 4  ;;  %s340_s3 = smov 128   ;;  %s168_s9 = int_to_ptr.vmem [resolvable:$true] %s167_s9 }
  0x13   :  { %s341_s13 = smov 8  }
  0x16   :  { %v199_v7 = vpop.eup %198 }
  0x17   :  { %v72_v8 = vmul.f32 256.0, %v199_v7  ;;  %vm76_vm0 = vweird.f32 %v199_v7 }
  0x19   :  { %v73_v9 = vsub.f32 1.0, %v72_v8 }
  0x1a   :  { %69 = vadd.xlane.f32.xlu0 %v68_v5 }
  0x1b   :  { %v74_v10 = vmul.f32 %v199_v7, %v73_v9 }
  0x1d   :  { %v75_v11 = vadd.f32 %v199_v7, %v74_v10 }
  0x1f   :  { %v77_v12 = vsel %vm76_vm0, %v199_v7, %v75_v11 }
  0x85   :  { %v67_v13 = vpop.xlane.xlu0 %66 }
  0x86   :  { %v78_v14 = vmul.f32 %v77_v12, %v67_v13 }
  0x88   :  { %v80_v15 = vsub.f32 %v61_v0, %v78_v14  ;;  %v81_v16 = vsub.f32 %v62_v1, %v78_v14 }
  0x8a   :  { %v84_v17 = vmul.f32 %v80_v15, %v80_v15  ;;  %v85_v18 = vmul.f32 %v81_v16, %v81_v16 }
  0x8c   :  { %v88_v19 = vadd.f32 %v85_v18, %v84_v17 }
  0x8d   :  { %v70_v20 = vpop.xlane.xlu0 %69 }
  0x8e   :  { %v79_v21 = vmul.f32 %v77_v12, %v70_v20  ;;  %89 = vadd.xlane.f32.xlu1 %v88_v19 }
  0x90   :  { %v82_v22 = vsub.f32 %v63_v3, %v79_v21  ;;  %v83_v23 = vsub.f32 %v64_v4, %v79_v21 }
  0x92   :  { %v86_v24 = vmul.f32 %v82_v22, %v82_v22  ;;  %v87_v25 = vmul.f32 %v83_v23, %v83_v23 }
  0x94   :  { %v91_v26 = vadd.f32 %v87_v25, %v86_v24 }
  0x96   :  { %92 = vadd.xlane.f32.xlu1 %v91_v26 }
 0x101   :  { %v90_v27 = vpop.xlane.xlu1 %89 }
 0x102   :  { %v94_v28 = vmul.f32 %v90_v27, %v77_v12 }
 0x104   :  { %v96_v29 = vadd.f32 1e-12, %v94_v28 }
 0x106   :  { %200 = vrsqrt.f32 %v96_v29  ;;  %vm104_vm2 = vweird.f32 %v96_v29 }
 0x109   :  { %v93_v30 = vpop.xlane.xlu1 %92 }
 0x10a   :  { %v95_v31 = vmul.f32 %v93_v30, %v77_v12 }
 0x10c   :  { %v201_v32 = vpop.eup %200  ;;  %v97_v33 = vadd.f32 1e-12, %v95_v31 }
 0x10d   :  { %v99_v34 = vmul.f32 %v201_v32, %v96_v29  ;;  %vm105_vm1 = vweird.f32 %v201_v32 }
 0x10e   :  { %202 = vrsqrt.f32 %v97_v33  ;;  %vm106_vm3 = vmor %vm104_vm2, %vm105_vm1  ;;  %vm114_vm5 = vweird.f32 %v97_v33 }
 0x10f   :  { %v100_v35 = vmul.f32 %v201_v32, %v99_v34 }
 0x111   :  { %v101_v36 = vmul.f32 0.5, %v100_v35 }
 0x113   :  { %v102_v38 = vsub.f32 1.5, %v101_v36 }
 0x114   :  { %v203_v39 = vpop.eup %202 }
 0x115   :  { %v103_v40 = vmul.f32 %v201_v32, %v102_v38  ;;  %v109_v41 = vmul.f32 %v203_v39, %v97_v33  ;;  %vm115_vm4 = vweird.f32 %v203_v39 }
 0x116   :  { %vm116_vm6 = vmor %vm114_vm5, %vm115_vm4 }
 0x117   :  { %v107_v45 = vsel %vm106_vm3, %v201_v32, %v103_v40  ;;  %v110_v46 = vmul.f32 %v203_v39, %v109_v41 }
 0x118   :  { %v118_v47 = vmul.f32 %v107_v45, %v80_v15  ;;  %v119_v48 = vmul.f32 %v107_v45, %v81_v16 }
 0x119   :  { %v111_v51 = vmul.f32 0.5, %v110_v46 }
 0x11a   :  { %v128_v52 = vmul.f32 %v124_v43, %v118_v47  ;;  %v129_v53 = vmul.f32 %v125_v44, %v119_v48 }
 0x11b   :  { %v112_v54 = vsub.f32 1.5, %v111_v51 }
 0x11c   :  { %v138_v55 = vadd.f32 %v134_v49, %v128_v52  ;;  %v139_v56 = vadd.f32 %v135_v50, %v129_v53 }
 0x11d   :  { %v113_v57 = vmul.f32 %v203_v39, %v112_v54 }
 0x11e   :  { %142 = vst [vmem:[#allocation8] sm:$0xff] %v138_v55  ;;  %v146_v58 = vpack.c.bf16 %v139_v56, %v138_v55 }
 0x11f   :  { %v117_v59 = vsel %vm116_vm6, %v203_v39, %v113_v57  ;;  %143 = vst [vmem:[#allocation8 + $0x8] sm:$0xff] %v139_v56 }
 0x120   :  { %v120_v60 = vmul.f32 %v117_v59, %v82_v22  ;;  %v121_v61 = vmul.f32 %v117_v59, %v83_v23  ;;  %148 = vst [vmem:[#allocation9] sm:$0xff] %v146_v58 }
 0x122   :  { %v130_v62 = vmul.f32 %v124_v43, %v120_v60  ;;  %v131_v63 = vmul.f32 %v125_v44, %v121_v61 }
 0x124   :  { %v140_v0 = vadd.f32 %v134_v49, %v130_v62  ;;  %v141_v1 = vadd.f32 %v135_v50, %v131_v63 }
 0x126   :  { %144 = vst [vmem:[#allocation8 + $0x10] sm:$0xff] %v140_v0  ;;  %v147_v2 = vpack.c.bf16 %v141_v1, %v140_v0 }
 0x127   :  { %145 = vst [vmem:[#allocation8 + $0x18] sm:$0xff] %v141_v1 }
 0x128   :  { %162 = dma.vmem_to_hbm [thread:$0]  %s155_s2, 512, %s157_s7, [#allocation4], %s334_s25, %s334_s25, %s335_s26   ;;  %149 = vst [vmem:[#allocation9 + $0x8] sm:$0xff] %v147_v2 }
 0x129   :  { %175 = dma.vmem_to_hbm [thread:$0]  %s168_s9, 256, %s170_s12, [#allocation10], %s340_s3, %s340_s3, %s341_s13  }
 0x12a   :  { %328 = dma.done.wait [#allocation4], 512  }
 0x12b   :  { %329 = vsyncadd [#allocation4], 4294966784 }
 0x12c   :  { %330 = dma.done.wait [#allocation10], 256  }
 0x12d   :  { %331 = vsyncadd [#allocation10], 4294967040 }
 0x12e   :  { %184 = vsyncpa [#allocation3], 1 }
 0x12f   :  { %185 = vsyncpa [#allocation6], 1 }
 0x130   :  { %186 = vsyncpa [#allocation4], 1 }
 0x131   :  { %187 = vsyncpa [#allocation10], 1 }

</bundles_post_ra>
